<compile_context>
chip_gen: v7x
topology: tpu7x:2x2x1
jax: 0.10.0
libtpu: 0.0.40
codegen_flags: <defaults>
</compile_context>

<pallas_src>
import functools

import jax
import jax.numpy as jnp
from jax.experimental import pallas as pl
from jax.experimental.pallas import tpu as pltpu


def _round_up(x, m):
    return (x + m - 1) // m * m


def _mlp_fused_kernel(x_ref, wh_ref, bh_ref, wl_ref, bl_ref, o_ref, h_ref, *,
                      num_hidden, in_pad, hid_pad):
    """Whole MLP for one batch tile.

    x_ref : (TILE_N, in_pad)                 bf16  input tile (lane-dense, zero padded)
    wh_ref: (num_hidden, din_stack, hid_pad) bf16  hidden-producing weights (VMEM-resident)
    bh_ref: (num_hidden, 1, hid_pad)         f32   hidden-producing biases
    wl_ref: (hid_pad, out_pad)               bf16  final projection weight
    bl_ref: (1, out_pad)                     f32   final projection bias
    o_ref : (TILE_N, out_pad)                f32   sigmoid output (padded cols = 0.5)
    h_ref : (TILE_N, hid_pad)                bf16  inter-layer activation scratch
    """
    # Hidden layers: Linear -> ReLU (-> dropout == identity at inference).
    for layer in range(num_hidden):                      # small static unroll
        if layer == 0:
            src = x_ref[...]                             # (TILE_N, in_pad) bf16
            w = wh_ref[0, :in_pad, :]                    # static slice = free ref view
        else:
            src = h_ref[...]                             # (TILE_N, hid_pad) bf16
            w = wh_ref[layer, :hid_pad, :]
        y = jnp.dot(src, w, preferred_element_type=jnp.float32)   # MXU, f32 accumulate
        y = y + bh_ref[layer]                            # f32 epilogue (no bf16 VPU on v5e)
        h_ref[...] = jnp.maximum(y, 0.0).astype(h_ref.dtype)      # single bf16 cast/layer

    # Final projection + sigmoid (EUP exp + recip), narrow out_pad columns only.
    y = jnp.dot(h_ref[...], wl_ref[...], preferred_element_type=jnp.float32)
    y = y + bl_ref[...]
    o_ref[...] = jax.nn.sigmoid(y).astype(o_ref.dtype)


def prepare_mlp_params(params):
    """One-time packing of (w [in,out], b [out]) layer params into MXU-ready stacks."""
    assert len(params) >= 2, "module always has >= 2 Linear layers"
    f_in = params[0][0].shape[0]
    hid = params[0][0].shape[1]
    out = params[-1][0].shape[1]
    num_hidden = len(params) - 1

    in_pad = _round_up(max(f_in, 128), 128)
    hid_pad = _round_up(max(hid, 128), 128)
    out_pad = _round_up(max(out, 128), 128)
    din_stack = max(in_pad, hid_pad)

    wh = jnp.zeros((num_hidden, din_stack, hid_pad), jnp.bfloat16)
    bh = jnp.zeros((num_hidden, 1, hid_pad), jnp.float32)
    for layer, (w, b) in enumerate(params[:-1]):
        din, dout = w.shape
        wh = wh.at[layer, :din, :dout].set(w.astype(jnp.bfloat16))
        bh = bh.at[layer, 0, :dout].set(b.astype(jnp.float32))

    wl_raw, bl_raw = params[-1]
    wl = jnp.zeros((hid_pad, out_pad), jnp.bfloat16)
    wl = wl.at[:wl_raw.shape[0], :out].set(wl_raw.astype(jnp.bfloat16))
    bl = jnp.zeros((1, out_pad), jnp.float32).at[0, :out].set(bl_raw.astype(jnp.float32))

    return dict(wh=wh, bh=bh, wl=wl, bl=bl, num_hidden=num_hidden,
                f_in=f_in, in_pad=in_pad, hid_pad=hid_pad,
                out_channels=out, out_pad=out_pad, din_stack=din_stack)


def mlp_forward(prep, x, *, tile_n=512):
    """prep: output of prepare_mlp_params. x: [N, in_channels] f32. Returns [N, out]."""
    N, f_in = x.shape
    assert f_in == prep["f_in"]
    in_pad, hid_pad, out_pad = prep["in_pad"], prep["hid_pad"], prep["out_pad"]
    din_stack, num_hidden = prep["din_stack"], prep["num_hidden"]

    # Batch tiling: multiple-of-8 rows; >= 2 grid steps when the batch allows it
    # (so dimension_semantics=("parallel",) shards across v7x's 2 TensorCores).
    n8 = _round_up(N, 8)
    tile_rows = min(tile_n, n8)
    if n8 >= 16 and n8 // tile_rows < 2:
        tile_rows = _round_up((n8 + 1) // 2, 8)
    n_pad = _round_up(n8, tile_rows)

    x_pad = jnp.zeros((n_pad, in_pad), jnp.bfloat16).at[:N, :f_in].set(
        x.astype(jnp.bfloat16))

    # Explicit VMEM budget -> vmem_limit_bytes (single-buffered weights via
    # Buffered(1), double-buffered x/out tiles, bf16 activation scratch, plus a
    # rough allowance for Mosaic matmul scratch). Clamped for v7x's 64 MiB.
    budget = (
        num_hidden * din_stack * hid_pad * 2 + hid_pad * out_pad * 2   # weights (1 copy)
        + num_hidden * 8 * hid_pad * 4 + 8 * out_pad * 4               # biases (sublane-padded)
        + 2 * tile_rows * in_pad * 2                                   # x tiles (double-buf)
        + 2 * tile_rows * out_pad * 4                                  # out tiles (double-buf)
        + tile_rows * hid_pad * 2                                      # h scratch
        + tile_rows * max(hid_pad, out_pad) * 4                        # matmul acc scratch
    )
    vmem_limit = int(min(max(2 * budget, 32 << 20), 56 << 20))

    kernel = functools.partial(_mlp_fused_kernel, num_hidden=num_hidden,
                               in_pad=in_pad, hid_pad=hid_pad)
    out_padded = pl.pallas_call(
        kernel,
        out_shape=jax.ShapeDtypeStruct((n_pad, out_pad), jnp.float32),
        grid=(n_pad // tile_rows,),
        in_specs=[
            pl.BlockSpec((tile_rows, in_pad), lambda i: (i, 0)),          # x tile (bf16)
            pl.BlockSpec((num_hidden, din_stack, hid_pad), lambda i: (0, 0, 0),
                         pipeline_mode=pl.Buffered(1)),                   # resident weights
            pl.BlockSpec((num_hidden, 1, hid_pad), lambda i: (0, 0, 0),
                         pipeline_mode=pl.Buffered(1)),                   # resident biases
            pl.BlockSpec((hid_pad, out_pad), lambda i: (0, 0),
                         pipeline_mode=pl.Buffered(1)),                   # final proj weight
            pl.BlockSpec((1, out_pad), lambda i: (0, 0),
                         pipeline_mode=pl.Buffered(1)),                   # final proj bias
        ],
        out_specs=pl.BlockSpec((tile_rows, out_pad), lambda i: (i, 0)),
        scratch_shapes=[pltpu.VMEM((tile_rows, hid_pad), jnp.bfloat16)],
        compiler_params=pltpu.CompilerParams(
            dimension_semantics=("parallel",),      # batch axis -> megacore sharding
            vmem_limit_bytes=vmem_limit,
        ),
    )(x_pad, prep["wh"], prep["bh"], prep["wl"], prep["bl"])

    return out_padded[:N, :prep["out_channels"]]


def init_mlp_params(key, in_channels, hidden_channels, out_channels, num_layers):
    """Deterministic init; mirrors the layer shapes of the PyTorch module."""
    dims = [in_channels] + [hidden_channels] * (num_layers - 1) + [out_channels]
    params = []
    for li in range(num_layers):
        fan_in, fan_out = dims[li], dims[li + 1]
        key, kw, kb = jax.random.split(key, 3)
        bound = 1.0 / jnp.sqrt(jnp.float32(fan_in))
        # stored as [in, out] (transposed relative to torch's [out, in])
        w = jax.random.uniform(kw, (fan_in, fan_out), jnp.float32, -bound, bound)
        b = jax.random.uniform(kb, (fan_out,), jnp.float32, -bound, bound)
        params.append((w, b))
    return params


if __name__ == "__main__":
    # Small shapes consistent with the module's forward (node-feature matrix).
    N = 8
    in_channels = 16
    hidden_channels = 32
    out_channels = 4
    num_layers = 3
    dropout = 0.5  # unused at inference

    key = jax.random.PRNGKey(0)
    key, kx = jax.random.split(key)
    x = jax.random.normal(kx, (N, in_channels), jnp.float32)
    params = init_mlp_params(key, in_channels, hidden_channels, out_channels, num_layers)

    prep = prepare_mlp_params(params)   # one-time packing, hoisted out of the forward path
    out = mlp_forward(prep, x)
    out = jax.block_until_ready(out)
    assert out.shape == (N, out_channels)

    # Reference 1: identical math in pure JAX (bf16 MXU inputs + bf16 inter-layer
    # activations, f32 accumulate/epilogue).
    ref = x.astype(jnp.bfloat16)
    for (w, b) in params[:-1]:
        y = jnp.dot(ref, w.astype(jnp.bfloat16), preferred_element_type=jnp.float32) + b
        ref = jnp.maximum(y, 0.0).astype(jnp.bfloat16)
    w, b = params[-1]
    ref = jax.nn.sigmoid(
        jnp.dot(ref, w.astype(jnp.bfloat16), preferred_element_type=jnp.float32) + b)
    assert jnp.allclose(out, ref, atol=2e-3, rtol=2e-3)

    # Reference 2: full-f32 forward (module semantics); looser tol for the bf16 MXU path.
    ref32 = x
    for (w, b) in params[:-1]:
        ref32 = jnp.maximum(ref32 @ w + b, 0.0)
    w, b = params[-1]
    ref32 = jax.nn.sigmoid(ref32 @ w + b)
    assert jnp.allclose(out, ref32, atol=3e-2, rtol=3e-2)

    print("KERNEL_OK")
</pallas_src>

<mosaic_0001>
module attributes {stable_mosaic.version = 11 : i64} {
  func.func @_mlp_fused_kernel(%arg0: i32, %arg1: memref<8x128xbf16, #tpu.memory_space<vmem>>, %arg2: memref<2x128x128xbf16, #tpu.memory_space<vmem>>, %arg3: memref<2x1x128xf32, #tpu.memory_space<vmem>>, %arg4: memref<128x128xbf16, #tpu.memory_space<vmem>>, %arg5: memref<1x128xf32, #tpu.memory_space<vmem>>, %arg6: memref<8x128xf32, #tpu.memory_space<vmem>>, %arg7: memref<8x128xbf16, #tpu.memory_space<vmem>>) attributes {dimension_semantics = [#tpu.dimension_semantics<parallel>], iteration_bounds = array<i64: 1>, scalar_prefetch = 0 : i64, scratch_operands = 1 : i64, tpu.core_type = #tpu.core_type<tc>, window_params = [{transform_indices = @transform_0, window_bounds = array<i64: 8, 128>}, {pipeline_mode = #tpu.pipeline_mode<synchronous>, transform_indices = @transform_1, window_bounds = array<i64: 2, 128, 128>}, {pipeline_mode = #tpu.pipeline_mode<synchronous>, transform_indices = @transform_2, window_bounds = array<i64: 2, 1, 128>}, {pipeline_mode = #tpu.pipeline_mode<synchronous>, transform_indices = @transform_3, window_bounds = array<i64: 128, 128>}, {pipeline_mode = #tpu.pipeline_mode<synchronous>, transform_indices = @transform_4, window_bounds = array<i64: 1, 128>}, {transform_indices = @transform_5, window_bounds = array<i64: 8, 128>}]} {
    %c0 = arith.constant 0 : index
    %c0_0 = arith.constant 0 : index
    %0 = vector.load %arg1[%c0, %c0_0] : memref<8x128xbf16, #tpu.memory_space<vmem>>, vector<8x128xbf16>
    %c0_1 = arith.constant 0 : index
    %c0_2 = arith.constant 0 : index
    %c0_3 = arith.constant 0 : index
    %1 = vector.load %arg2[%c0_1, %c0_2, %c0_3] : memref<2x128x128xbf16, #tpu.memory_space<vmem>>, vector<1x128x128xbf16>
    %2 = vector.shape_cast %1 : vector<1x128x128xbf16> to vector<128x128xbf16>
    %cst = arith.constant dense<0.000000e+00> : vector<8x128xf32>
    %3 = tpu.matmul %0, %2, %cst {dimension_numbers = #tpu.dot_dimension_numbers<[1], [0], [0], [1], [0, 0, 1, 1], [], []>} : vector<8x128xbf16>, vector<128x128xbf16>, vector<8x128xf32> -> vector<8x128xf32>
    %c0_4 = arith.constant 0 : index
    %c0_5 = arith.constant 0 : index
    %c0_6 = arith.constant 0 : index
    %4 = vector.load %arg3[%c0_4, %c0_5, %c0_6] : memref<2x1x128xf32, #tpu.memory_space<vmem>>, vector<1x1x128xf32>
    %5 = vector.shape_cast %4 : vector<1x1x128xf32> to vector<1x128xf32>
    %6 = vector.broadcast %5 : vector<1x128xf32> to vector<8x128xf32>
    %7 = arith.addf %3, %6 : vector<8x128xf32>
    %cst_7 = arith.constant 0.000000e+00 : f32
    %8 = vector.broadcast %cst_7 : f32 to vector<8x128xf32>
    %9 = arith.maximumf %7, %8 : vector<8x128xf32>
    %10 = arith.truncf %9 : vector<8x128xf32> to vector<8x128xbf16>
    %c0_8 = arith.constant 0 : index
    %c0_9 = arith.constant 0 : index
    %11 = vector.load %arg7[%c0_8, %c0_9] : memref<8x128xbf16, #tpu.memory_space<vmem>>, vector<8x128xbf16>
    tpu.vector_store %arg7[%c0_8, %c0_9], %10 {strides = array<i32>} : memref<8x128xbf16, #tpu.memory_space<vmem>>, vector<8x128xbf16>,
    %c0_10 = arith.constant 0 : index
    %c0_11 = arith.constant 0 : index
    %12 = vector.load %arg7[%c0_10, %c0_11] : memref<8x128xbf16, #tpu.memory_space<vmem>>, vector<8x128xbf16>
    %c1 = arith.constant 1 : index
    %c0_12 = arith.constant 0 : index
    %c0_13 = arith.constant 0 : index
    %13 = vector.load %arg2[%c1, %c0_12, %c0_13] : memref<2x128x128xbf16, #tpu.memory_space<vmem>>, vector<1x128x128xbf16>
    %14 = vector.shape_cast %13 : vector<1x128x128xbf16> to vector<128x128xbf16>
    %cst_14 = arith.constant dense<0.000000e+00> : vector<8x128xf32>
    %15 = tpu.matmul %12, %14, %cst_14 {dimension_numbers = #tpu.dot_dimension_numbers<[1], [0], [0], [1], [0, 0, 1, 1], [], []>} : vector<8x128xbf16>, vector<128x128xbf16>, vector<8x128xf32> -> vector<8x128xf32>
    %c1_15 = arith.constant 1 : index
    %c0_16 = arith.constant 0 : index
    %c0_17 = arith.constant 0 : index
    %16 = vector.load %arg3[%c1_15, %c0_16, %c0_17] : memref<2x1x128xf32, #tpu.memory_space<vmem>>, vector<1x1x128xf32>
    %17 = vector.shape_cast %16 : vector<1x1x128xf32> to vector<1x128xf32>
    %18 = vector.broadcast %17 : vector<1x128xf32> to vector<8x128xf32>
    %19 = arith.addf %15, %18 : vector<8x128xf32>
    %cst_18 = arith.constant 0.000000e+00 : f32
    %20 = vector.broadcast %cst_18 : f32 to vector<8x128xf32>
    %21 = arith.maximumf %19, %20 : vector<8x128xf32>
    %22 = arith.truncf %21 : vector<8x128xf32> to vector<8x128xbf16>
    %c0_19 = arith.constant 0 : index
    %c0_20 = arith.constant 0 : index
    %23 = vector.load %arg7[%c0_19, %c0_20] : memref<8x128xbf16, #tpu.memory_space<vmem>>, vector<8x128xbf16>
    tpu.vector_store %arg7[%c0_19, %c0_20], %22 {strides = array<i32>} : memref<8x128xbf16, #tpu.memory_space<vmem>>, vector<8x128xbf16>,
    %c0_21 = arith.constant 0 : index
    %c0_22 = arith.constant 0 : index
    %24 = vector.load %arg7[%c0_21, %c0_22] : memref<8x128xbf16, #tpu.memory_space<vmem>>, vector<8x128xbf16>
    %c0_23 = arith.constant 0 : index
    %c0_24 = arith.constant 0 : index
    %25 = vector.load %arg4[%c0_23, %c0_24] : memref<128x128xbf16, #tpu.memory_space<vmem>>, vector<128x128xbf16>
    %cst_25 = arith.constant dense<0.000000e+00> : vector<8x128xf32>
    %26 = tpu.matmul %24, %25, %cst_25 {dimension_numbers = #tpu.dot_dimension_numbers<[1], [0], [0], [1], [0, 0, 1, 1], [], []>} : vector<8x128xbf16>, vector<128x128xbf16>, vector<8x128xf32> -> vector<8x128xf32>
    %c0_26 = arith.constant 0 : index
    %c0_27 = arith.constant 0 : index
    %27 = vector.load %arg5[%c0_26, %c0_27] : memref<1x128xf32, #tpu.memory_space<vmem>>, vector<1x128xf32>
    %28 = vector.broadcast %27 : vector<1x128xf32> to vector<8x128xf32>
    %29 = arith.addf %26, %28 : vector<8x128xf32>
    %30 = arith.negf %29 : vector<8x128xf32>
    %31 = math.exp %30 : vector<8x128xf32>
    %cst_28 = arith.constant 1.000000e+00 : f32
    %32 = vector.broadcast %cst_28 : f32 to vector<8x128xf32>
    %33 = arith.addf %32, %31 : vector<8x128xf32>
    %34 = arith.divf %32, %33 : vector<8x128xf32>
    %c0_29 = arith.constant 0 : index
    %c0_30 = arith.constant 0 : index
    %35 = vector.load %arg6[%c0_29, %c0_30] : memref<8x128xf32, #tpu.memory_space<vmem>>, vector<8x128xf32>
    tpu.vector_store %arg6[%c0_29, %c0_30], %34 {strides = array<i32>} : memref<8x128xf32, #tpu.memory_space<vmem>>, vector<8x128xf32>,
    return
  }
  func.func @transform_0(%arg0: i32) -> (i32, i32) {
    %c0_i32 = arith.constant 0 : i32
    %c0_i32_0 = arith.constant 0 : i32
    return %arg0, %c0_i32 : i32, i32
  }
  func.func @transform_1(%arg0: i32) -> (i32, i32, i32) {
    %c0_i32 = arith.constant 0 : i32
    %c0_i32_0 = arith.constant 0 : i32
    %c0_i32_1 = arith.constant 0 : i32
    %c0_i32_2 = arith.constant 0 : i32
    return %c0_i32, %c0_i32_0, %c0_i32_1 : i32, i32, i32
  }
  func.func @transform_2(%arg0: i32) -> (i32, i32, i32) {
    %c0_i32 = arith.constant 0 : i32
    %c0_i32_0 = arith.constant 0 : i32
    %c0_i32_1 = arith.constant 0 : i32
    %c0_i32_2 = arith.constant 0 : i32
    return %c0_i32, %c0_i32_0, %c0_i32_1 : i32, i32, i32
  }
  func.func @transform_3(%arg0: i32) -> (i32, i32) {
    %c0_i32 = arith.constant 0 : i32
    %c0_i32_0 = arith.constant 0 : i32
    %c0_i32_1 = arith.constant 0 : i32
    return %c0_i32, %c0_i32_0 : i32, i32
  }
  func.func @transform_4(%arg0: i32) -> (i32, i32) {
    %c0_i32 = arith.constant 0 : i32
    %c0_i32_0 = arith.constant 0 : i32
    %c0_i32_1 = arith.constant 0 : i32
    return %c0_i32, %c0_i32_0 : i32, i32
  }
  func.func @transform_5(%arg0: i32) -> (i32, i32) {
    %c0_i32 = arith.constant 0 : i32
    %c0_i32_0 = arith.constant 0 : i32
    return %arg0, %c0_i32 : i32, i32
  }
}

</mosaic_0001>

<bundles_post_ra>
// kernel: tpu_custom_call.1
= control target key start
LH: loop header
LB: loop body
LE: loop exit
PB: predicated region body
PF: predicated region fallthrough
CT: control target
= control target key end

     0   :  { %10 = vsyncpa [#allocation4], 0  ;;  %s805_s0 = inlined_call_operand.hbm [shape: bf16[8,128], index: 0, kind: input, shape index: {}]   ;;  %s806_s1 = inlined_call_operand.hbm [shape: bf16[2,128,128], index: 1, kind: input, shape index: {}]   ;;  %s807_s2 = inlined_call_operand.vmem [shape: f32[2,1,128], index: 2, kind: input, shape index: {}]   ;;  %s808_s3 = inlined_call_operand.hbm [shape: bf16[128,128], index: 3, kind: input, shape index: {}]   ;;  %s809_s4 = inlined_call_operand.vmem [shape: f32[1,128], index: 4, kind: input, shape index: {}]   ;;  %s810_s5 = inlined_call_operand.hbm [shape: f32[8,128], index: 5, kind: output, shape index: {}]  }
   0x1   :  { %11 = vsyncpa [#allocation7], 0 }
   0x2   :  { %12 = vsyncpa [#allocation5], 0  ;;  %s674_s18 = smov [#allocation6]   ;;  %s580_s22 = scalar_lea.hbm %s806_s1, 2048 }
   0x3   :  { %s28_s19 = sshll.u32 %s674_s18, 4  ;;  %p581_p0 = scmp.ne.s32.totalorder %s806_s1, %s580_s22  ;;  %s29_s19 = int_to_ptr.vmem [resolvable:$true] %s28_s19 }
   0x4   :  { %p584_p1 = scmp.lt.u32.totalorder %s580_s22, %s806_s1 }
   0x6   :  { %p586_p2 = pnand %p584_p1, %p581_p0 }
   0x8   :  { %589 = shalt.err (!%p586_p2)
}
   0x9   :  { %s590_s27 = scalar_lea.vmem %s29_s19, 2048  ;;  %p595_p4 = scmp.lt.s32.totalorder %s29_s19, %s29_s19 }
   0xa   :  { %p591_p3 = scmp.ne.s32.totalorder %s29_s19, %s590_s27  ;;  %p596_p5 = scmp.lt.s32.totalorder %s590_s27, %s590_s27 }
   0xc   :  { %p597_p6 = por %p596_p5, %p595_p4 }
   0xe   :  { %p598_p7 = pnand %p597_p6, %p591_p3 }
  0x10   :  { %601 = shalt.err (!%p598_p7)
}
  0x11   :  { %s675_s28 = smov 64   ;;  %s676_s29 = smov 4  }
  0x12   :  { %34 = dma.hbm_to_vmem [thread:$0]  %s806_s1, 2048, %s29_s19, [#allocation7], %s675_s28, %s675_s28, %s676_s29  }
  0x13   :  { %s677_s7 = smov [#allocation3]   ;;  %s678_s9 = smov [#allocation8]  }
  0x14   :  { %s19_s8 = sshll.u32 %s677_s7, 4  ;;  %s42_s10 = sshll.u32 %s678_s9, 4  ;;  %s20_s8 = int_to_ptr.vmem [resolvable:$true] %s19_s8  ;;  %s43_s10 = int_to_ptr.vmem [resolvable:$true] %s42_s10 }
  0x15   :  { %s602_s13 = scalar_lea.hbm %s805_s0, 64 }
  0x16   :  { %p603_p8 = scmp.ne.s32.totalorder %s805_s0, %s602_s13  ;;  %p606_p9 = scmp.lt.u32.totalorder %s602_s13, %s805_s0 }
  0x18   :  { %p608_p10 = pnand %p606_p9, %p603_p8 }
  0x1a   :  { %611 = shalt.err (!%p608_p10)
}
  0x1b   :  { %s612_s1 = scalar_lea.vmem %s20_s8, 64  ;;  %p617_p12 = scmp.lt.s32.totalorder %s20_s8, %s20_s8 }
  0x1c   :  { %p613_p11 = scmp.ne.s32.totalorder %s20_s8, %s612_s1  ;;  %p618_p13 = scmp.lt.s32.totalorder %s612_s1, %s612_s1 }
  0x1e   :  { %p619_p0 = por %p618_p13, %p617_p12 }
  0x20   :  { %p620_p1 = pnand %p619_p0, %p613_p11 }
  0x22   :  { %623 = shalt.err (!%p620_p1)
}
  0x23   :  { %22 = dma.hbm_to_vmem [thread:$0]  %s805_s0, 64, %s20_s8, [#allocation4]  }
  0x24   :  { %s624_s22 = scalar_lea.hbm %s808_s3, 1024 }
  0x25   :  { %p625_p2 = scmp.ne.s32.totalorder %s808_s3, %s624_s22  ;;  %p628_p3 = scmp.lt.u32.totalorder %s624_s22, %s808_s3 }
  0x27   :  { %p630_p4 = pnand %p628_p3, %p625_p2 }
  0x29   :  { %633 = shalt.err (!%p630_p4)
}
  0x2a   :  { %s634_s27 = scalar_lea.vmem %s43_s10, 1024  ;;  %p639_p6 = scmp.lt.s32.totalorder %s43_s10, %s43_s10 }
  0x2b   :  { %p635_p5 = scmp.ne.s32.totalorder %s43_s10, %s634_s27  ;;  %p640_p7 = scmp.lt.s32.totalorder %s634_s27, %s634_s27 }
  0x2d   :  { %p641_p8 = por %p640_p7, %p639_p6 }
  0x2f   :  { %p642_p9 = pnand %p641_p8, %p635_p5 }
  0x31   :  { %645 = shalt.err (!%p642_p9)
}
  0x32   :  { %48 = dma.hbm_to_vmem [thread:$0]  %s808_s3, 1024, %s43_s10, [#allocation7], %s675_s28, %s675_s28, %s676_s29  }
  0x33   :  { %668 = dma.done.wait [#allocation4], 64  }
  0x34   :  { %669 = vsyncadd [#allocation4], 4294967232 }
  0x35   :  { %670 = dma.done.wait [#allocation7], 3072  }
  0x36   :  { %671 = vsyncadd [#allocation7], 4294964224  ;;  %v679_v0 = vmov 0.0   ;;  %vm680_vm0 = vmmov 0   ;;  %v552_v1 = vld [vmem:[#allocation6] sm:$0xff]   ;;  %v553_v2 = vld [vmem:[#allocation6 + $0x8] sm:$0xff]  }
  0x37   :  { %484 = vmatprep.subr.bf16.mxu0 %v679_v0  ;;  %500 = vmatprep.mubr.msk.bf16.mxu0 %vm680_vm0, %v679_v0  ;;  %v554_v3 = vld [vmem:[#allocation6 + $0x10] sm:$0xff]   ;;  %v560_v4 = vld [vmem:[#allocation6 + $0x40] sm:$0xff]   ;;  %v555_v5 = vld [vmem:[#allocation6 + $0x18] sm:$0xff]  }
  0x38   :  { %504 = vmatprep.subr.bf16.mxu1 %v679_v0  ;;  %520 = vmatprep.mubr.msk.bf16.mxu1 %vm680_vm0, %v679_v0  ;;  %v561_v6 = vld [vmem:[#allocation6 + $0x48] sm:$0xff]   ;;  %v556_v7 = vld [vmem:[#allocation6 + $0x20] sm:$0xff]   ;;  %v562_v8 = vld [vmem:[#allocation6 + $0x50] sm:$0xff]  }
  0x39   :  { %485 = vmatpush3.bf16.msra.mxu0 %v552_v1  ;;  %505 = vmatpush3.bf16.msra.mxu1 %v560_v4  ;;  %v557_v9 = vld [vmem:[#allocation6 + $0x28] sm:$0xff]   ;;  %v563_v10 = vld [vmem:[#allocation6 + $0x58] sm:$0xff]   ;;  %v558_v11 = vld [vmem:[#allocation6 + $0x30] sm:$0xff]  }
  0x3a   :  { %486 = vmatprep.subr.bf16.mxu0 %v679_v0  ;;  %506 = vmatprep.subr.bf16.mxu1 %v679_v0  ;;  %v559_v12 = vld [vmem:[#allocation6 + $0x38] sm:$0xff]   ;;  %v564_v14 = vld [vmem:[#allocation6 + $0x60] sm:$0xff]   ;;  %v565_v15 = vld [vmem:[#allocation6 + $0x68] sm:$0xff]  }
  0x3b   :  { %v61_v13 = vld [vmem:[#allocation3] sm:$0xf]  ;;  %v566_v16 = vld [vmem:[#allocation6 + $0x70] sm:$0xff]   ;;  %v568_v18 = vld [vmem:[#allocation8] sm:$0xff]  }
  0x3c   :  { %v567_v17 = vld [vmem:[#allocation6 + $0x78] sm:$0xff]   ;;  %v569_v19 = vld [vmem:[#allocation8 + $0x8] sm:$0xff]   ;;  %v570_v20 = vld [vmem:[#allocation8 + $0x10] sm:$0xff]  }
  0x3d   :  { %487 = vmatpush3.bf16.msra.mxu0 %v553_v2  ;;  %507 = vmatpush3.bf16.msra.mxu1 %v561_v6  ;;  %v571_v21 = vld [vmem:[#allocation8 + $0x18] sm:$0xff]   ;;  %v572_v31 = vld [vmem:[#allocation8 + $0x20] sm:$0xff]   ;;  %v573_v32 = vld [vmem:[#allocation8 + $0x28] sm:$0xff]  }
  0x3e   :  { %488 = vmatprep.subr.bf16.mxu0 %v679_v0  ;;  %508 = vmatprep.subr.bf16.mxu1 %v679_v0  ;;  %v428_v22 = vld [vmem:[%s807_s2] ss:$0 sm:$0xff]  ;;  %v574_v33 = vld [vmem:[#allocation8 + $0x30] sm:$0xff]   ;;  %v438_v35 = vld [vmem:[%s807_s2 + $0x1] ss:$0 sm:$0xff]  ;;  %s681_s2 = smov [#allocation9]  }
  0x3f   :  { %v575_v34 = vld [vmem:[#allocation8 + $0x38] sm:$0xff]   ;;  %s418_s9 = sshll.u32 %s681_s2, 4  ;;  %s419_s9 = int_to_ptr.vmem [resolvable:$true] %s418_s9 }
  0x40   :  { %v447_v44 = vld [vmem:[%s809_s4] ss:$0 sm:$0xff]  ;;  %s646_s10 = scalar_lea.vmem %s419_s9, 128  ;;  %p651_p11 = scmp.lt.s32.totalorder %s419_s9, %s419_s9 }
  0x41   :  { %489 = vmatpush3.bf16.msra.mxu0 %v554_v3  ;;  %509 = vmatpush3.bf16.msra.mxu1 %v562_v8  ;;  %p647_p10 = scmp.ne.s32.totalorder %s419_s9, %s646_s10  ;;  %p652_p12 = scmp.lt.s32.totalorder %s646_s10, %s646_s10 }
  0x42   :  { %490 = vmatprep.subr.bf16.mxu0 %v679_v0  ;;  %510 = vmatprep.subr.bf16.mxu1 %v679_v0 }
  0x43   :  { %p653_p13 = por %p652_p12, %p651_p11 }
  0x45   :  { %491 = vmatpush3.bf16.msra.mxu0 %v555_v5  ;;  %511 = vmatpush3.bf16.msra.mxu1 %v563_v10  ;;  %p654_p0 = pnand %p653_p13, %p647_p10 }
  0x46   :  { %492 = vmatprep.subr.bf16.mxu0 %v679_v0  ;;  %512 = vmatprep.subr.bf16.mxu1 %v679_v0 }
  0x49   :  { %493 = vmatpush3.bf16.msra.mxu0 %v556_v7  ;;  %513 = vmatpush3.bf16.msra.mxu1 %v564_v14 }
  0x4a   :  { %494 = vmatprep.subr.bf16.mxu0 %v679_v0  ;;  %514 = vmatprep.subr.bf16.mxu1 %v679_v0 }
  0x4d   :  { %495 = vmatpush3.bf16.msra.mxu0 %v557_v9  ;;  %515 = vmatpush3.bf16.msra.mxu1 %v565_v15 }
  0x4e   :  { %496 = vmatprep.subr.bf16.mxu0 %v679_v0  ;;  %516 = vmatprep.subr.bf16.mxu1 %v679_v0 }
  0x51   :  { %497 = vmatpush3.bf16.msra.mxu0 %v558_v11  ;;  %517 = vmatpush3.bf16.msra.mxu1 %v566_v16 }
  0x52   :  { %498 = vmatprep.subr.bf16.mxu0 %v679_v0  ;;  %518 = vmatprep.subr.bf16.mxu1 %v679_v0 }
  0x55   :  { %499 = vmatpush3.bf16.msra.mxu0 %v559_v12  ;;  %519 = vmatpush3.bf16.msra.mxu1 %v567_v17 }
  0x56   :  { %524 = vmatprep.subr.bf16.mxu0 %v679_v0 }
  0x58   :  { %501 = vmatmul.mubr.bf16.vlgmr.msra.gmra.mrb[0].mxu0 %v61_v13 }
  0x59   :  { %540 = vmatprep.mubr.msk.bf16.mxu0 %vm680_vm0, %v679_v0  ;;  %525 = vmatpush3.bf16.msra.mxu0 %v568_v18 }
  0x5a   :  { %526 = vmatprep.subr.bf16.mxu0 %v679_v0 }
  0x5d   :  { %527 = vmatpush3.bf16.msra.mxu0 %v569_v19 }
  0x5e   :  { %528 = vmatprep.subr.bf16.mxu0 %v679_v0 }
  0x61   :  { %529 = vmatpush3.bf16.msra.mxu0 %v570_v20 }
  0x62   :  { %530 = vmatprep.subr.bf16.mxu0 %v679_v0 }
  0x65   :  { %531 = vmatpush3.bf16.msra.mxu0 %v571_v21 }
  0x66   :  { %532 = vmatprep.subr.bf16.mxu0 %v679_v0 }
  0x69   :  { %533 = vmatpush3.bf16.msra.mxu0 %v572_v31 }
  0x6a   :  { %534 = vmatprep.subr.bf16.mxu0 %v679_v0 }
  0x6d   :  { %535 = vmatpush3.bf16.msra.mxu0 %v573_v32 }
  0x6e   :  { %536 = vmatprep.subr.bf16.mxu0 %v679_v0 }
  0x71   :  { %537 = vmatpush3.bf16.msra.mxu0 %v574_v33 }
  0x72   :  { %538 = vmatprep.subr.bf16.mxu0 %v679_v0 }
  0x75   :  { %539 = vmatpush3.bf16.msra.mxu0 %v575_v34 }
 0x12b   :  { %v167_v23 = vpop.f32.mrb[0].mxu0 }
 0x12c   :  { %v168_v24 = vadd.f32 %v428_v22, %v167_v23  ;;  %v502_v25 = vpop.f32.mrb[1].mxu0 }
 0x12d   :  { %v170_v26 = vpop.f32.mrb[2].mxu0 }
 0x12e   :  { %v173_v27 = vmax.f32 %v168_v24, 0.0  ;;  %v503_v28 = vpop.f32.mrb[3].mxu0 }
 0x130   :  { %v174_v29 = vpack.c.bf16 %v173_v27, %v173_v27 }
 0x132   :  { %175 = vst [vmem:[#allocation2] sm:$0xf] %v174_v29 }
 0x139   :  { %v176_v30 = vld [vmem:[#allocation2] sm:$0xf] }
 0x13a   :  { %521 = vmatmul.mubr.bf16.vlgmr.msra.gmra.mrb[0].mxu1 %v176_v30 }
 0x20d   :  { %v284_v36 = vpop.f32.mrb[0].mxu1 }
 0x20e   :  { %v285_v37 = vadd.f32 %v438_v35, %v284_v36  ;;  %v522_v38 = vpop.f32.mrb[1].mxu1 }
 0x20f   :  { %v287_v39 = vpop.f32.mrb[2].mxu1 }
 0x210   :  { %v290_v40 = vmax.f32 %v285_v37, 0.0  ;;  %v523_v41 = vpop.f32.mrb[3].mxu1 }
 0x212   :  { %v291_v42 = vpack.c.bf16 %v290_v40, %v290_v40 }
 0x214   :  { %292 = vst [vmem:[#allocation2] sm:$0xf] %v291_v42 }
 0x21b   :  { %v293_v43 = vld [vmem:[#allocation2] sm:$0xf] }
 0x21c   :  { %541 = vmatmul.mubr.bf16.vlgmr.msra.gmra.mrb[4].mxu0 %v293_v43 }
 0x2ef   :  { %v399_v45 = vpop.f32.mrb[4].mxu0 }
 0x2f0   :  { %v400_v46 = vadd.f32 %v447_v44, %v399_v45  ;;  %v542_v47 = vpop.f32.mrb[5].mxu0 }
 0x2f1   :  { %v402_v48 = vpop.f32.mrb[6].mxu0 }
 0x2f2   :  { %v456_v49 = vmul.f32 -1.442695, %v400_v46  ;;  %v543_v50 = vpop.f32.mrb[7].mxu0 }
 0x2f4   :  { %576 = vpow2.f32 %v456_v49 }
 0x2fe   :  { %v577_v51 = vpop.eup %576 }
 0x2ff   :  { %v408_v52 = vadd.f32 1.0, %v577_v51 }
 0x301   :  { %578 = vrcp.f32 %v408_v52 }
 0x30b   :  { %v579_v53 = vpop.eup %578 }
 0x30c   :  { %411 = vst [vmem:[#allocation9] sm:$0xff] %v579_v53 }
 0x30d   :  { %657 = shalt.err (!%p654_p0)
}
 0x30e   :  { %s658_s12 = scalar_lea.hbm %s810_s5, 128 }
 0x30f   :  { %p659_p1 = scmp.ne.s32.totalorder %s810_s5, %s658_s12  ;;  %p662_p2 = scmp.lt.u32.totalorder %s658_s12, %s810_s5 }
 0x311   :  { %p664_p3 = pnand %p662_p2, %p659_p1 }
 0x313   :  { %667 = shalt.err (!%p664_p3)
}
 0x314   :  { %421 = dma.vmem_to_hbm [thread:$0]  %s419_s9, 128, %s810_s5, [#allocation5]  }
 0x315   :  { %672 = dma.done.wait [#allocation5], 128  }
 0x316   :  { %673 = vsyncadd [#allocation5], 4294967168 }
 0x317   :  { %425 = vsyncpa [#allocation4], 1 }
 0x318   :  { %426 = vsyncpa [#allocation7], 1 }
 0x319   :  { %427 = vsyncpa [#allocation5], 1 }

</bundles_post_ra>
